<compile_context>
chip_gen: v7x
topology: tpu7x:2x2x1
jax: 0.10.0
libtpu: 0.0.40
codegen_flags: <defaults>
</compile_context>

<pallas_src>
import functools
import math

import jax
import jax.numpy as jnp
from jax import lax
from jax.experimental import pallas as pl
from jax.experimental.pallas import tpu as pltpu

# Per-class weights from FocalLoss2D.__init__ (19 classes).
_CLASS_WEIGHTS = (
    0.05570516, 0.32337477, 0.08998544, 1.03602707, 1.03413147, 1.68195437,
    5.58540548, 3.56563995, 0.12704978, 1.0, 0.46783719, 1.34551528,
    5.29974114, 0.28342531, 0.9396095, 0.81551811, 0.42679146, 3.6399074,
    2.78376194,
)
NUM_CLASSES = len(_CLASS_WEIGHTS)
_LANES = 128            # lane width of a vreg
_MAX_R_TILE = 1024      # 1024 rows * 128 lanes = 131072 pixels per grid step


def _weighted_ce_kernel(logits_ref, targets_ref, out_ref, *, ignore_label, r_chunk):
    """Per-pixel weighted cross entropy for one (spatial-tile, image) grid step.

    logits_ref : (1, C, R_TILE, 128)  f32 or bf16
    targets_ref: (1, R_TILE, 128)     int32
    out_ref    : (1, R_TILE, 128)     f32   (0.0 where target == ignore_label / pad)
    """
    r_tile = targets_ref.shape[1]
    n_chunks = r_tile // r_chunk

    # ignore_label=250 never matches a class, so w_t is already exactly 0 there
    # and the explicit mask is only needed if ignore_label collides with a class.
    need_ignore_mask = 0 <= ignore_label < NUM_CLASSES

    def body(i, carry):
        r0 = pl.multiple_of(i * r_chunk, r_chunk)
        tgt = targets_ref[0, pl.ds(r0, r_chunk), :]                    # (r_chunk, 128) i32

        # Single sweep over VMEM: each class slice is loaded exactly once and
        # kept register-resident in its input dtype (bf16 stays packed).
        xs = [logits_ref[0, c, pl.ds(r0, r_chunk), :] for c in range(NUM_CLASSES)]

        # Max over classes in the native dtype (compare-only, exact in bf16).
        m = xs[0]
        for c in range(1, NUM_CLASSES):
            m = jnp.maximum(m, xs[c])
        m = m.astype(jnp.float32)

        # Sum-exp + target-logit gather + per-class weight gather (one upcast
        # per class slice, compile-time scalar weight constants).
        s = jnp.zeros_like(m)
        picked = jnp.zeros_like(m)
        w_t = jnp.zeros_like(m)
        for c in range(NUM_CLASSES):
            x = xs[c].astype(jnp.float32)
            s = s + jnp.exp(x - m)
            sel = tgt == c
            picked = jnp.where(sel, x, picked)
            w_t = jnp.where(sel, _CLASS_WEIGHTS[c], w_t)

        nll = jnp.log(s) + m - picked                                  # -log softmax[target]
        loss = w_t * nll                                               # exact 0 for ignore/pad pixels
        if need_ignore_mask:
            loss = jnp.where(tgt != ignore_label, loss, 0.0)
        out_ref[0, pl.ds(r0, r_chunk), :] = loss
        return carry

    lax.fori_loop(0, n_chunks, body, 0, unroll=min(2, n_chunks))


def _pick_r_tile(r_rows, row_align, max_r_tile):
    """Largest spatial tile that avoids padding the logits.

    Prefers (a) the full row extent if it fits in one tile, then (b) the
    largest exact divisor of r_rows that is a multiple of row_align, and only
    falls back to (c) a partial last block (handled natively by Pallas)."""
    if r_rows <= max_r_tile:
        return r_rows                                   # block dim == full array dim
    for d in range(max_r_tile, row_align - 1, -1):
        if d % row_align == 0 and r_rows % d == 0:
            return d
    return max_r_tile                                   # ragged last block


def weighted_ce_per_pixel(logits4, targets3, *, ignore_label, r_tile):
    """logits4 (N, C, R, 128) float; targets3 (N, R, 128) int32
    -> (N, R, 128) f32 per-pixel weighted CE (0 at ignore_label / pad)."""
    N, C, R, L = logits4.shape
    assert L == _LANES and C == NUM_CLASSES

    base_chunk = 16 if logits4.dtype == jnp.bfloat16 else 8
    r_chunk = base_chunk if r_tile % base_chunk == 0 else math.gcd(r_tile, base_chunk)

    num_spatial = pl.cdiv(R, r_tile)
    kernel = functools.partial(_weighted_ce_kernel,
                               ignore_label=ignore_label, r_chunk=r_chunk)

    # Double-buffered blocks (logits + targets + output) plus headroom.
    logits_block_bytes = C * r_tile * L * logits4.dtype.itemsize
    io_block_bytes = 2 * r_tile * L * 4                 # int32 targets + f32 out
    vmem_limit = min(max(2 * (logits_block_bytes + io_block_bytes) + (8 << 20),
                         32 << 20), 60 << 20)

    return pl.pallas_call(
        kernel,
        out_shape=jax.ShapeDtypeStruct((N, R, L), jnp.float32),
        grid=(num_spatial, N),
        in_specs=[
            pl.BlockSpec((1, C, r_tile, L), lambda t, n: (n, 0, t, 0)),
            pl.BlockSpec((1, r_tile, L), lambda t, n: (n, t, 0)),
        ],
        out_specs=pl.BlockSpec((1, r_tile, L), lambda t, n: (n, t, 0)),
        compiler_params=pltpu.CompilerParams(
            dimension_semantics=("parallel", "parallel"),
            vmem_limit_bytes=vmem_limit),
    )(logits4, targets3)


def _topk_mean(per_pixel, top_k):
    """Mean of the top_k per-pixel losses per image. per_pixel (N, HW), values >= 0.

    For large HW this uses an exact hierarchical top-k (per-chunk top_k followed
    by a final top_k over the candidates) so the XLA sort never sees the full
    pixel count. -1.0 padding can never displace real (>= 0) losses.
    """
    # TODO(synk): a fully in-kernel partial top-k has no clean Mosaic lowering
    # (no sort primitive); done in JAX glue instead.
    N, HW = per_pixel.shape
    chunk = max(2048, int(top_k))
    if HW > 4 * chunk:
        n_chunks = -(-HW // chunk)
        pad = n_chunks * chunk - HW
        if pad:
            per_pixel = jnp.pad(per_pixel, ((0, 0), (0, pad)), constant_values=-1.0)
        cand, _ = jax.lax.top_k(per_pixel.reshape(N, n_chunks, chunk), top_k)
        vals, _ = jax.lax.top_k(cand.reshape(N, n_chunks * top_k), top_k)
    else:
        vals, _ = jax.lax.top_k(per_pixel, top_k)
    return jnp.sum(vals, axis=1) / float(top_k)


def focal_loss_2d(predictions, targets, *, top_k=128, ignore_label=250,
                  alpha=0.25, gamma=2.0):
    """JAX/Pallas equivalent of FocalLoss2D.forward (single-tensor input).

    predictions: (N, C, H, W) float32 or bfloat16 (bf16 halves HBM traffic;
                 the log-softmax math stays f32 inside the kernel)
    targets:     (N, H, W)    int
    returns scalar loss.
    """
    N, C, H, W = predictions.shape
    assert C == NUM_CLASSES
    HW = H * W
    assert HW >= top_k, "top_k must not exceed the number of pixels per image"

    logits = predictions.reshape(N, C, HW)
    tgt = targets.reshape(N, HW).astype(jnp.int32)

    # Lane alignment: the pixel axis must be a multiple of 128 to be viewed as
    # (rows, 128) without a copy.  Most segmentation shapes satisfy this; the
    # rare remainder is padded minimally (<128 pixels) with ignore_label targets
    # so the padded pixels carry an exact 0 loss.
    lane_pad = (-HW) % _LANES
    if lane_pad:
        # TODO(synk): a dedicated ragged-tail kernel would avoid this copy.
        logits = jnp.pad(logits, ((0, 0), (0, 0), (0, lane_pad)))
        tgt = jnp.pad(tgt, ((0, 0), (0, lane_pad)), constant_values=ignore_label)
    r_rows = (HW + lane_pad) // _LANES

    row_align = 16 if predictions.dtype == jnp.bfloat16 else 8
    r_tile = _pick_r_tile(r_rows, row_align, _MAX_R_TILE)

    logits4 = logits.reshape(N, C, r_rows, _LANES)      # zero-copy views
    tgt3 = tgt.reshape(N, r_rows, _LANES)

    per_pixel = weighted_ce_per_pixel(
        logits4, tgt3, ignore_label=ignore_label, r_tile=r_tile)   # (N, R, 128)
    # Free reshape; any padded pixels are exact zeros and cannot change the
    # top-k of non-negative losses -> no slice/copy needed.
    per_pixel = per_pixel.reshape(N, r_rows * _LANES)

    per_image = _topk_mean(per_pixel, top_k)                       # (N,)
    loss_fuse = jnp.sum(per_image) / float(N)

    log_pt = -loss_fuse
    return -((1.0 - jnp.exp(log_pt)) ** gamma) * alpha * log_pt


def _reference_focal_loss(predictions, targets, *, top_k, ignore_label, alpha, gamma):
    """Pure-JAX reference mirroring the PyTorch module (for correctness check)."""
    N, C, H, W = predictions.shape
    logp = jax.nn.log_softmax(predictions.astype(jnp.float32), axis=1)
    tgt = targets.astype(jnp.int32)
    valid = tgt != ignore_label
    tgt_safe = jnp.where(valid, tgt, 0)
    picked = jnp.take_along_axis(logp, tgt_safe[:, None, :, :], axis=1)[:, 0]
    w = jnp.asarray(_CLASS_WEIGHTS, jnp.float32)[tgt_safe]
    ce = jnp.where(valid, -w * picked, 0.0).reshape(N, H * W)
    vals, _ = jax.lax.top_k(ce, top_k)
    loss_fuse = jnp.sum(jnp.sum(vals, axis=1) / float(top_k)) / float(N)
    log_pt = -loss_fuse
    return -((1.0 - jnp.exp(log_pt)) ** gamma) * alpha * log_pt


if __name__ == "__main__":
    key = jax.random.PRNGKey(0)
    k_pred, k_tgt, k_ign = jax.random.split(key, 3)

    N, C, H, W = 2, NUM_CLASSES, 16, 16   # H*W = 256 >= top_k = 128
    predictions = jax.random.normal(k_pred, (N, C, H, W), dtype=jnp.float32)
    targets = jax.random.randint(k_tgt, (N, H, W), 0, NUM_CLASSES, dtype=jnp.int32)
    # Sprinkle in some ignore_label pixels deterministically.
    ignore_mask = jax.random.uniform(k_ign, (N, H, W)) < 0.1
    targets = jnp.where(ignore_mask, 250, targets)

    # f32 path (matches the PyTorch reference dtype).
    loss = focal_loss_2d(predictions, targets, top_k=128, ignore_label=250,
                         alpha=0.25, gamma=2.0)
    loss = jax.block_until_ready(loss)
    assert loss.shape == () and bool(jnp.isfinite(loss))

    ref = jax.block_until_ready(
        _reference_focal_loss(predictions, targets, top_k=128, ignore_label=250,
                              alpha=0.25, gamma=2.0))
    assert bool(jnp.allclose(loss, ref, rtol=1e-4, atol=1e-5)), (loss, ref)

    # bf16 path (halves the dominant HBM stream; in-kernel math stays f32 apart
    # from the compare-only max pass -> input-quantization-level tolerance).
    loss_bf16 = focal_loss_2d(predictions.astype(jnp.bfloat16), targets,
                              top_k=128, ignore_label=250, alpha=0.25, gamma=2.0)
    loss_bf16 = jax.block_until_ready(loss_bf16)
    assert bool(jnp.isfinite(loss_bf16))

    print("KERNEL_OK")
</pallas_src>

<mosaic_0001>
module attributes {stable_mosaic.version = 11 : i64} {
  func.func @_weighted_ce_kernel(%arg0: i32, %arg1: i32, %arg2: memref<1x19x2x128xf32, #tpu.memory_space<vmem>>, %arg3: memref<1x2x128xi32, #tpu.memory_space<vmem>>, %arg4: memref<1x2x128xf32, #tpu.memory_space<vmem>>) attributes {dimension_semantics = [#tpu.dimension_semantics<parallel>, #tpu.dimension_semantics<parallel>], iteration_bounds = array<i64: 1, 2>, scalar_prefetch = 0 : i64, scratch_operands = 0 : i64, tpu.core_type = #tpu.core_type<tc>, window_params = [{transform_indices = @transform_0, window_bounds = array<i64: 1, 19, 2, 128>}, {transform_indices = @transform_1, window_bounds = array<i64: 1, 2, 128>}, {transform_indices = @transform_2, window_bounds = array<i64: 1, 2, 128>}]} {
    %c0_i32 = arith.constant 0 : i32
    %c2_i32 = arith.constant 2 : i32
    %0 = arith.muli %c0_i32, %c2_i32 : i32
    %1 = tpu.assume_multiple %0, 2 : i32
    %c0 = arith.constant 0 : index
    %2 = arith.index_cast %1 : i32 to index
    %c0_0 = arith.constant 0 : index
    %3 = vector.load %arg3[%c0, %2, %c0_0] : memref<1x2x128xi32, #tpu.memory_space<vmem>>, vector<1x2x128xi32>
    %4 = vector.shape_cast %3 : vector<1x2x128xi32> to vector<2x128xi32>
    %c0_1 = arith.constant 0 : index
    %c0_2 = arith.constant 0 : index
    %5 = arith.index_cast %1 : i32 to index
    %c0_3 = arith.constant 0 : index
    %6 = vector.load %arg2[%c0_1, %c0_2, %5, %c0_3] : memref<1x19x2x128xf32, #tpu.memory_space<vmem>>, vector<1x1x2x128xf32>
    %7 = vector.shape_cast %6 : vector<1x1x2x128xf32> to vector<2x128xf32>
    %c0_4 = arith.constant 0 : index
    %c1 = arith.constant 1 : index
    %8 = arith.index_cast %1 : i32 to index
    %c0_5 = arith.constant 0 : index
    %9 = vector.load %arg2[%c0_4, %c1, %8, %c0_5] : memref<1x19x2x128xf32, #tpu.memory_space<vmem>>, vector<1x1x2x128xf32>
    %10 = vector.shape_cast %9 : vector<1x1x2x128xf32> to vector<2x128xf32>
    %c0_6 = arith.constant 0 : index
    %c2 = arith.constant 2 : index
    %11 = arith.index_cast %1 : i32 to index
    %c0_7 = arith.constant 0 : index
    %12 = vector.load %arg2[%c0_6, %c2, %11, %c0_7] : memref<1x19x2x128xf32, #tpu.memory_space<vmem>>, vector<1x1x2x128xf32>
    %13 = vector.shape_cast %12 : vector<1x1x2x128xf32> to vector<2x128xf32>
    %c0_8 = arith.constant 0 : index
    %c3 = arith.constant 3 : index
    %14 = arith.index_cast %1 : i32 to index
    %c0_9 = arith.constant 0 : index
    %15 = vector.load %arg2[%c0_8, %c3, %14, %c0_9] : memref<1x19x2x128xf32, #tpu.memory_space<vmem>>, vector<1x1x2x128xf32>
    %16 = vector.shape_cast %15 : vector<1x1x2x128xf32> to vector<2x128xf32>
    %c0_10 = arith.constant 0 : index
    %c4 = arith.constant 4 : index
    %17 = arith.index_cast %1 : i32 to index
    %c0_11 = arith.constant 0 : index
    %18 = vector.load %arg2[%c0_10, %c4, %17, %c0_11] : memref<1x19x2x128xf32, #tpu.memory_space<vmem>>, vector<1x1x2x128xf32>
    %19 = vector.shape_cast %18 : vector<1x1x2x128xf32> to vector<2x128xf32>
    %c0_12 = arith.constant 0 : index
    %c5 = arith.constant 5 : index
    %20 = arith.index_cast %1 : i32 to index
    %c0_13 = arith.constant 0 : index
    %21 = vector.load %arg2[%c0_12, %c5, %20, %c0_13] : memref<1x19x2x128xf32, #tpu.memory_space<vmem>>, vector<1x1x2x128xf32>
    %22 = vector.shape_cast %21 : vector<1x1x2x128xf32> to vector<2x128xf32>
    %c0_14 = arith.constant 0 : index
    %c6 = arith.constant 6 : index
    %23 = arith.index_cast %1 : i32 to index
    %c0_15 = arith.constant 0 : index
    %24 = vector.load %arg2[%c0_14, %c6, %23, %c0_15] : memref<1x19x2x128xf32, #tpu.memory_space<vmem>>, vector<1x1x2x128xf32>
    %25 = vector.shape_cast %24 : vector<1x1x2x128xf32> to vector<2x128xf32>
    %c0_16 = arith.constant 0 : index
    %c7 = arith.constant 7 : index
    %26 = arith.index_cast %1 : i32 to index
    %c0_17 = arith.constant 0 : index
    %27 = vector.load %arg2[%c0_16, %c7, %26, %c0_17] : memref<1x19x2x128xf32, #tpu.memory_space<vmem>>, vector<1x1x2x128xf32>
    %28 = vector.shape_cast %27 : vector<1x1x2x128xf32> to vector<2x128xf32>
    %c0_18 = arith.constant 0 : index
    %c8 = arith.constant 8 : index
    %29 = arith.index_cast %1 : i32 to index
    %c0_19 = arith.constant 0 : index
    %30 = vector.load %arg2[%c0_18, %c8, %29, %c0_19] : memref<1x19x2x128xf32, #tpu.memory_space<vmem>>, vector<1x1x2x128xf32>
    %31 = vector.shape_cast %30 : vector<1x1x2x128xf32> to vector<2x128xf32>
    %c0_20 = arith.constant 0 : index
    %c9 = arith.constant 9 : index
    %32 = arith.index_cast %1 : i32 to index
    %c0_21 = arith.constant 0 : index
    %33 = vector.load %arg2[%c0_20, %c9, %32, %c0_21] : memref<1x19x2x128xf32, #tpu.memory_space<vmem>>, vector<1x1x2x128xf32>
    %34 = vector.shape_cast %33 : vector<1x1x2x128xf32> to vector<2x128xf32>
    %c0_22 = arith.constant 0 : index
    %c10 = arith.constant 10 : index
    %35 = arith.index_cast %1 : i32 to index
    %c0_23 = arith.constant 0 : index
    %36 = vector.load %arg2[%c0_22, %c10, %35, %c0_23] : memref<1x19x2x128xf32, #tpu.memory_space<vmem>>, vector<1x1x2x128xf32>
    %37 = vector.shape_cast %36 : vector<1x1x2x128xf32> to vector<2x128xf32>
    %c0_24 = arith.constant 0 : index
    %c11 = arith.constant 11 : index
    %38 = arith.index_cast %1 : i32 to index
    %c0_25 = arith.constant 0 : index
    %39 = vector.load %arg2[%c0_24, %c11, %38, %c0_25] : memref<1x19x2x128xf32, #tpu.memory_space<vmem>>, vector<1x1x2x128xf32>
    %40 = vector.shape_cast %39 : vector<1x1x2x128xf32> to vector<2x128xf32>
    %c0_26 = arith.constant 0 : index
    %c12 = arith.constant 12 : index
    %41 = arith.index_cast %1 : i32 to index
    %c0_27 = arith.constant 0 : index
    %42 = vector.load %arg2[%c0_26, %c12, %41, %c0_27] : memref<1x19x2x128xf32, #tpu.memory_space<vmem>>, vector<1x1x2x128xf32>
    %43 = vector.shape_cast %42 : vector<1x1x2x128xf32> to vector<2x128xf32>
    %c0_28 = arith.constant 0 : index
    %c13 = arith.constant 13 : index
    %44 = arith.index_cast %1 : i32 to index
    %c0_29 = arith.constant 0 : index
    %45 = vector.load %arg2[%c0_28, %c13, %44, %c0_29] : memref<1x19x2x128xf32, #tpu.memory_space<vmem>>, vector<1x1x2x128xf32>
    %46 = vector.shape_cast %45 : vector<1x1x2x128xf32> to vector<2x128xf32>
    %c0_30 = arith.constant 0 : index
    %c14 = arith.constant 14 : index
    %47 = arith.index_cast %1 : i32 to index
    %c0_31 = arith.constant 0 : index
    %48 = vector.load %arg2[%c0_30, %c14, %47, %c0_31] : memref<1x19x2x128xf32, #tpu.memory_space<vmem>>, vector<1x1x2x128xf32>
    %49 = vector.shape_cast %48 : vector<1x1x2x128xf32> to vector<2x128xf32>
    %c0_32 = arith.constant 0 : index
    %c15 = arith.constant 15 : index
    %50 = arith.index_cast %1 : i32 to index
    %c0_33 = arith.constant 0 : index
    %51 = vector.load %arg2[%c0_32, %c15, %50, %c0_33] : memref<1x19x2x128xf32, #tpu.memory_space<vmem>>, vector<1x1x2x128xf32>
    %52 = vector.shape_cast %51 : vector<1x1x2x128xf32> to vector<2x128xf32>
    %c0_34 = arith.constant 0 : index
    %c16 = arith.constant 16 : index
    %53 = arith.index_cast %1 : i32 to index
    %c0_35 = arith.constant 0 : index
    %54 = vector.load %arg2[%c0_34, %c16, %53, %c0_35] : memref<1x19x2x128xf32, #tpu.memory_space<vmem>>, vector<1x1x2x128xf32>
    %55 = vector.shape_cast %54 : vector<1x1x2x128xf32> to vector<2x128xf32>
    %c0_36 = arith.constant 0 : index
    %c17 = arith.constant 17 : index
    %56 = arith.index_cast %1 : i32 to index
    %c0_37 = arith.constant 0 : index
    %57 = vector.load %arg2[%c0_36, %c17, %56, %c0_37] : memref<1x19x2x128xf32, #tpu.memory_space<vmem>>, vector<1x1x2x128xf32>
    %58 = vector.shape_cast %57 : vector<1x1x2x128xf32> to vector<2x128xf32>
    %c0_38 = arith.constant 0 : index
    %c18 = arith.constant 18 : index
    %59 = arith.index_cast %1 : i32 to index
    %c0_39 = arith.constant 0 : index
    %60 = vector.load %arg2[%c0_38, %c18, %59, %c0_39] : memref<1x19x2x128xf32, #tpu.memory_space<vmem>>, vector<1x1x2x128xf32>
    %61 = vector.shape_cast %60 : vector<1x1x2x128xf32> to vector<2x128xf32>
    %62 = arith.maximumf %7, %10 : vector<2x128xf32>
    %63 = arith.maximumf %62, %13 : vector<2x128xf32>
    %64 = arith.maximumf %63, %16 : vector<2x128xf32>
    %65 = arith.maximumf %64, %19 : vector<2x128xf32>
    %66 = arith.maximumf %65, %22 : vector<2x128xf32>
    %67 = arith.maximumf %66, %25 : vector<2x128xf32>
    %68 = arith.maximumf %67, %28 : vector<2x128xf32>
    %69 = arith.maximumf %68, %31 : vector<2x128xf32>
    %70 = arith.maximumf %69, %34 : vector<2x128xf32>
    %71 = arith.maximumf %70, %37 : vector<2x128xf32>
    %72 = arith.maximumf %71, %40 : vector<2x128xf32>
    %73 = arith.maximumf %72, %43 : vector<2x128xf32>
    %74 = arith.maximumf %73, %46 : vector<2x128xf32>
    %75 = arith.maximumf %74, %49 : vector<2x128xf32>
    %76 = arith.maximumf %75, %52 : vector<2x128xf32>
    %77 = arith.maximumf %76, %55 : vector<2x128xf32>
    %78 = arith.maximumf %77, %58 : vector<2x128xf32>
    %79 = arith.maximumf %78, %61 : vector<2x128xf32>
    %cst = arith.constant 0.000000e+00 : f32
    %80 = vector.broadcast %cst : f32 to vector<2x128xf32>
    %cst_40 = arith.constant 0.000000e+00 : f32
    %81 = vector.broadcast %cst_40 : f32 to vector<2x128xf32>
    %cst_41 = arith.constant 0.000000e+00 : f32
    %82 = vector.broadcast %cst_41 : f32 to vector<2x128xf32>
    %83 = arith.subf %7, %79 : vector<2x128xf32>
    %84 = math.exp %83 : vector<2x128xf32>
    %85 = arith.addf %80, %84 : vector<2x128xf32>
    %c0_i32_42 = arith.constant 0 : i32
    %86 = vector.broadcast %c0_i32_42 : i32 to vector<2x128xi32>
    %87 = arith.cmpi eq, %4, %86 : vector<2x128xi32>
    %88 = arith.select %87, %7, %81 : vector<2x128xi1>, vector<2x128xf32>
    %cst_43 = arith.constant 0.0557051599 : f32
    %89 = vector.broadcast %cst_43 : f32 to vector<2x128xf32>
    %90 = arith.select %87, %89, %82 : vector<2x128xi1>, vector<2x128xf32>
    %91 = arith.subf %10, %79 : vector<2x128xf32>
    %92 = math.exp %91 : vector<2x128xf32>
    %93 = arith.addf %85, %92 : vector<2x128xf32>
    %c1_i32 = arith.constant 1 : i32
    %94 = vector.broadcast %c1_i32 : i32 to vector<2x128xi32>
    %95 = arith.cmpi eq, %4, %94 : vector<2x128xi32>
    %96 = arith.select %95, %10, %88 : vector<2x128xi1>, vector<2x128xf32>
    %cst_44 = arith.constant 0.323374778 : f32
    %97 = vector.broadcast %cst_44 : f32 to vector<2x128xf32>
    %98 = arith.select %95, %97, %90 : vector<2x128xi1>, vector<2x128xf32>
    %99 = arith.subf %13, %79 : vector<2x128xf32>
    %100 = math.exp %99 : vector<2x128xf32>
    %101 = arith.addf %93, %100 : vector<2x128xf32>
    %c2_i32_45 = arith.constant 2 : i32
    %102 = vector.broadcast %c2_i32_45 : i32 to vector<2x128xi32>
    %103 = arith.cmpi eq, %4, %102 : vector<2x128xi32>
    %104 = arith.select %103, %13, %96 : vector<2x128xi1>, vector<2x128xf32>
    %cst_46 = arith.constant 0.0899854376 : f32
    %105 = vector.broadcast %cst_46 : f32 to vector<2x128xf32>
    %106 = arith.select %103, %105, %98 : vector<2x128xi1>, vector<2x128xf32>
    %107 = arith.subf %16, %79 : vector<2x128xf32>
    %108 = math.exp %107 : vector<2x128xf32>
    %109 = arith.addf %101, %108 : vector<2x128xf32>
    %c3_i32 = arith.constant 3 : i32
    %110 = vector.broadcast %c3_i32 : i32 to vector<2x128xi32>
    %111 = arith.cmpi eq, %4, %110 : vector<2x128xi32>
    %112 = arith.select %111, %16, %104 : vector<2x128xi1>, vector<2x128xf32>
    %cst_47 = arith.constant 1.03602707 : f32
    %113 = vector.broadcast %cst_47 : f32 to vector<2x128xf32>
    %114 = arith.select %111, %113, %106 : vector<2x128xi1>, vector<2x128xf32>
    %115 = arith.subf %19, %79 : vector<2x128xf32>
    %116 = math.exp %115 : vector<2x128xf32>
    %117 = arith.addf %109, %116 : vector<2x128xf32>
    %c4_i32 = arith.constant 4 : i32
    %118 = vector.broadcast %c4_i32 : i32 to vector<2x128xi32>
    %119 = arith.cmpi eq, %4, %118 : vector<2x128xi32>
    %120 = arith.select %119, %19, %112 : vector<2x128xi1>, vector<2x128xf32>
    %cst_48 = arith.constant 1.03413153 : f32
    %121 = vector.broadcast %cst_48 : f32 to vector<2x128xf32>
    %122 = arith.select %119, %121, %114 : vector<2x128xi1>, vector<2x128xf32>
    %123 = arith.subf %22, %79 : vector<2x128xf32>
    %124 = math.exp %123 : vector<2x128xf32>
    %125 = arith.addf %117, %124 : vector<2x128xf32>
    %c5_i32 = arith.constant 5 : i32
    %126 = vector.broadcast %c5_i32 : i32 to vector<2x128xi32>
    %127 = arith.cmpi eq, %4, %126 : vector<2x128xi32>
    %128 = arith.select %127, %22, %120 : vector<2x128xi1>, vector<2x128xf32>
    %cst_49 = arith.constant 1.68195438 : f32
    %129 = vector.broadcast %cst_49 : f32 to vector<2x128xf32>
    %130 = arith.select %127, %129, %122 : vector<2x128xi1>, vector<2x128xf32>
    %131 = arith.subf %25, %79 : vector<2x128xf32>
    %132 = math.exp %131 : vector<2x128xf32>
    %133 = arith.addf %125, %132 : vector<2x128xf32>
    %c6_i32 = arith.constant 6 : i32
    %134 = vector.broadcast %c6_i32 : i32 to vector<2x128xi32>
    %135 = arith.cmpi eq, %4, %134 : vector<2x128xi32>
    %136 = arith.select %135, %25, %128 : vector<2x128xi1>, vector<2x128xf32>
    %cst_50 = arith.constant 5.58540535 : f32
    %137 = vector.broadcast %cst_50 : f32 to vector<2x128xf32>
    %138 = arith.select %135, %137, %130 : vector<2x128xi1>, vector<2x128xf32>
    %139 = arith.subf %28, %79 : vector<2x128xf32>
    %140 = math.exp %139 : vector<2x128xf32>
    %141 = arith.addf %133, %140 : vector<2x128xf32>
    %c7_i32 = arith.constant 7 : i32
    %142 = vector.broadcast %c7_i32 : i32 to vector<2x128xi32>
    %143 = arith.cmpi eq, %4, %142 : vector<2x128xi32>
    %144 = arith.select %143, %28, %136 : vector<2x128xi1>, vector<2x128xf32>
    %cst_51 = arith.constant 3.565640e+00 : f32
    %145 = vector.broadcast %cst_51 : f32 to vector<2x128xf32>
    %146 = arith.select %143, %145, %138 : vector<2x128xi1>, vector<2x128xf32>
    %147 = arith.subf %31, %79 : vector<2x128xf32>
    %148 = math.exp %147 : vector<2x128xf32>
    %149 = arith.addf %141, %148 : vector<2x128xf32>
    %c8_i32 = arith.constant 8 : i32
    %150 = vector.broadcast %c8_i32 : i32 to vector<2x128xi32>
    %151 = arith.cmpi eq, %4, %150 : vector<2x128xi32>
    %152 = arith.select %151, %31, %144 : vector<2x128xi1>, vector<2x128xf32>
    %cst_52 = arith.constant 0.127049774 : f32
    %153 = vector.broadcast %cst_52 : f32 to vector<2x128xf32>
    %154 = arith.select %151, %153, %146 : vector<2x128xi1>, vector<2x128xf32>
    %155 = arith.subf %34, %79 : vector<2x128xf32>
    %156 = math.exp %155 : vector<2x128xf32>
    %157 = arith.addf %149, %156 : vector<2x128xf32>
    %c9_i32 = arith.constant 9 : i32
    %158 = vector.broadcast %c9_i32 : i32 to vector<2x128xi32>
    %159 = arith.cmpi eq, %4, %158 : vector<2x128xi32>
    %160 = arith.select %159, %34, %152 : vector<2x128xi1>, vector<2x128xf32>
    %cst_53 = arith.constant 1.000000e+00 : f32
    %161 = vector.broadcast %cst_53 : f32 to vector<2x128xf32>
    %162 = arith.select %159, %161, %154 : vector<2x128xi1>, vector<2x128xf32>
    %163 = arith.subf %37, %79 : vector<2x128xf32>
    %164 = math.exp %163 : vector<2x128xf32>
    %165 = arith.addf %157, %164 : vector<2x128xf32>
    %c10_i32 = arith.constant 10 : i32
    %166 = vector.broadcast %c10_i32 : i32 to vector<2x128xi32>
    %167 = arith.cmpi eq, %4, %166 : vector<2x128xi32>
    %168 = arith.select %167, %37, %160 : vector<2x128xi1>, vector<2x128xf32>
    %cst_54 = arith.constant 0.467837185 : f32
    %169 = vector.broadcast %cst_54 : f32 to vector<2x128xf32>
    %170 = arith.select %167, %169, %162 : vector<2x128xi1>, vector<2x128xf32>
    %171 = arith.subf %40, %79 : vector<2x128xf32>
    %172 = math.exp %171 : vector<2x128xf32>
    %173 = arith.addf %165, %172 : vector<2x128xf32>
    %c11_i32 = arith.constant 11 : i32
    %174 = vector.broadcast %c11_i32 : i32 to vector<2x128xi32>
    %175 = arith.cmpi eq, %4, %174 : vector<2x128xi32>
    %176 = arith.select %175, %40, %168 : vector<2x128xi1>, vector<2x128xf32>
    %cst_55 = arith.constant 1.34551525 : f32
    %177 = vector.broadcast %cst_55 : f32 to vector<2x128xf32>
    %178 = arith.select %175, %177, %170 : vector<2x128xi1>, vector<2x128xf32>
    %179 = arith.subf %43, %79 : vector<2x128xf32>
    %180 = math.exp %179 : vector<2x128xf32>
    %181 = arith.addf %173, %180 : vector<2x128xf32>
    %c12_i32 = arith.constant 12 : i32
    %182 = vector.broadcast %c12_i32 : i32 to vector<2x128xi32>
    %183 = arith.cmpi eq, %4, %182 : vector<2x128xi32>
    %184 = arith.select %183, %43, %176 : vector<2x128xi1>, vector<2x128xf32>
    %cst_56 = arith.constant 5.29974127 : f32
    %185 = vector.broadcast %cst_56 : f32 to vector<2x128xf32>
    %186 = arith.select %183, %185, %178 : vector<2x128xi1>, vector<2x128xf32>
    %187 = arith.subf %46, %79 : vector<2x128xf32>
    %188 = math.exp %187 : vector<2x128xf32>
    %189 = arith.addf %181, %188 : vector<2x128xf32>
    %c13_i32 = arith.constant 13 : i32
    %190 = vector.broadcast %c13_i32 : i32 to vector<2x128xi32>
    %191 = arith.cmpi eq, %4, %190 : vector<2x128xi32>
    %192 = arith.select %191, %46, %184 : vector<2x128xi1>, vector<2x128xf32>
    %cst_57 = arith.constant 0.283425301 : f32
    %193 = vector.broadcast %cst_57 : f32 to vector<2x128xf32>
    %194 = arith.select %191, %193, %186 : vector<2x128xi1>, vector<2x128xf32>
    %195 = arith.subf %49, %79 : vector<2x128xf32>
    %196 = math.exp %195 : vector<2x128xf32>
    %197 = arith.addf %189, %196 : vector<2x128xf32>
    %c14_i32 = arith.constant 14 : i32
    %198 = vector.broadcast %c14_i32 : i32 to vector<2x128xi32>
    %199 = arith.cmpi eq, %4, %198 : vector<2x128xi32>
    %200 = arith.select %199, %49, %192 : vector<2x128xi1>, vector<2x128xf32>
    %cst_58 = arith.constant 0.939609527 : f32
    %201 = vector.broadcast %cst_58 : f32 to vector<2x128xf32>
    %202 = arith.select %199, %201, %194 : vector<2x128xi1>, vector<2x128xf32>
    %203 = arith.subf %52, %79 : vector<2x128xf32>
    %204 = math.exp %203 : vector<2x128xf32>
    %205 = arith.addf %197, %204 : vector<2x128xf32>
    %c15_i32 = arith.constant 15 : i32
    %206 = vector.broadcast %c15_i32 : i32 to vector<2x128xi32>
    %207 = arith.cmpi eq, %4, %206 : vector<2x128xi32>
    %208 = arith.select %207, %52, %200 : vector<2x128xi1>, vector<2x128xf32>
    %cst_59 = arith.constant 0.815518081 : f32
    %209 = vector.broadcast %cst_59 : f32 to vector<2x128xf32>
    %210 = arith.select %207, %209, %202 : vector<2x128xi1>, vector<2x128xf32>
    %211 = arith.subf %55, %79 : vector<2x128xf32>
    %212 = math.exp %211 : vector<2x128xf32>
    %213 = arith.addf %205, %212 : vector<2x128xf32>
    %c16_i32 = arith.constant 16 : i32
    %214 = vector.broadcast %c16_i32 : i32 to vector<2x128xi32>
    %215 = arith.cmpi eq, %4, %214 : vector<2x128xi32>
    %216 = arith.select %215, %55, %208 : vector<2x128xi1>, vector<2x128xf32>
    %cst_60 = arith.constant 0.426791459 : f32
    %217 = vector.broadcast %cst_60 : f32 to vector<2x128xf32>
    %218 = arith.select %215, %217, %210 : vector<2x128xi1>, vector<2x128xf32>
    %219 = arith.subf %58, %79 : vector<2x128xf32>
    %220 = math.exp %219 : vector<2x128xf32>
    %221 = arith.addf %213, %220 : vector<2x128xf32>
    %c17_i32 = arith.constant 17 : i32
    %222 = vector.broadcast %c17_i32 : i32 to vector<2x128xi32>
    %223 = arith.cmpi eq, %4, %222 : vector<2x128xi32>
    %224 = arith.select %223, %58, %216 : vector<2x128xi1>, vector<2x128xf32>
    %cst_61 = arith.constant 3.63990736 : f32
    %225 = vector.broadcast %cst_61 : f32 to vector<2x128xf32>
    %226 = arith.select %223, %225, %218 : vector<2x128xi1>, vector<2x128xf32>
    %227 = arith.subf %61, %79 : vector<2x128xf32>
    %228 = math.exp %227 : vector<2x128xf32>
    %229 = arith.addf %221, %228 : vector<2x128xf32>
    %c18_i32 = arith.constant 18 : i32
    %230 = vector.broadcast %c18_i32 : i32 to vector<2x128xi32>
    %231 = arith.cmpi eq, %4, %230 : vector<2x128xi32>
    %232 = arith.select %231, %61, %224 : vector<2x128xi1>, vector<2x128xf32>
    %cst_62 = arith.constant 2.78376198 : f32
    %233 = vector.broadcast %cst_62 : f32 to vector<2x128xf32>
    %234 = arith.select %231, %233, %226 : vector<2x128xi1>, vector<2x128xf32>
    %235 = math.log %229 : vector<2x128xf32>
    %236 = arith.addf %235, %79 : vector<2x128xf32>
    %237 = arith.subf %236, %232 : vector<2x128xf32>
    %238 = arith.mulf %234, %237 : vector<2x128xf32>
    %c0_63 = arith.constant 0 : index
    %239 = arith.index_cast %1 : i32 to index
    %c0_64 = arith.constant 0 : index
    %240 = vector.load %arg4[%c0_63, %239, %c0_64] : memref<1x2x128xf32, #tpu.memory_space<vmem>>, vector<1x2x128xf32>
    %241 = vector.shape_cast %240 : vector<1x2x128xf32> to vector<2x128xf32>
    %242 = vector.shape_cast %238 : vector<2x128xf32> to vector<1x2x128xf32>
    tpu.vector_store %arg4[%c0_63, %239, %c0_64], %242 {strides = array<i32>} : memref<1x2x128xf32, #tpu.memory_space<vmem>>, vector<1x2x128xf32>,
    %c1_i32_65 = arith.constant 1 : i32
    return
  }
  func.func @transform_0(%arg0: i32, %arg1: i32) -> (i32, i32, i32, i32) {
    %c0_i32 = arith.constant 0 : i32
    %c0_i32_0 = arith.constant 0 : i32
    %c0_i32_1 = arith.constant 0 : i32
    return %arg1, %c0_i32, %arg0, %c0_i32_0 : i32, i32, i32, i32
  }
  func.func @transform_1(%arg0: i32, %arg1: i32) -> (i32, i32, i32) {
    %c0_i32 = arith.constant 0 : i32
    %c0_i32_0 = arith.constant 0 : i32
    return %arg1, %arg0, %c0_i32 : i32, i32, i32
  }
  func.func @transform_2(%arg0: i32, %arg1: i32) -> (i32, i32, i32) {
    %c0_i32 = arith.constant 0 : i32
    %c0_i32_0 = arith.constant 0 : i32
    return %arg1, %arg0, %c0_i32 : i32, i32, i32
  }
}

</mosaic_0001>

<bundles_post_ra>
// kernel: tpu_custom_call.1
= control target key start
LH: loop header
LB: loop body
LE: loop exit
PB: predicated region body
PF: predicated region fallthrough
CT: control target
= control target key end

     0   :  { %7 = vsyncpa [#allocation3], 0  ;;  %s1341_s0 = inlined_call_operand.hbm [shape: f32[2,19,2,128], index: 0, kind: input, shape index: {}]   ;;  %s1342_s1 = inlined_call_operand.hbm [shape: s32[2,2,128], index: 1, kind: input, shape index: {}]   ;;  %s1343_s2 = inlined_call_operand.hbm [shape: f32[2,2,128], index: 2, kind: output, shape index: {}]  }
   0x1   :  { %9 = vsyncpa [#allocation3 + $0x1], 0 }
   0x2   :  { %10 = vsyncpa [#allocation6], 0 }
   0x3   :  { %12 = vsyncpa [#allocation6 + $0x1], 0 }
   0x4   :  { %13 = vsyncpa [#allocation4], 0 }
   0x5   :  { %15 = vsyncpa [#allocation4 + $0x1], 0  ;;  %s884_s9 = smov 0   ;;  %s886_s10 = smov 0  }
   0x6   :  { %s888_s11 = smov 0   ;;  %s890_s12 = smov 0  }
   0x7   :  { %s892_s13 = smov 0   ;;  %s894_s14 = smov 0  }
   0x8 LB: > { %s570_s15 = sadd.s32 4294967295, %s861_s14   ;;  %s571_s16 = sadd.s32 4294967294, %s861_s14   ;;  %s861_s14 = sphi %s894_s14, %s21_s14   ;;  %s857_s13 = sphi %s892_s13, %s1368_s13   ;;  %s853_s12 = sphi %s890_s12, %s1367_s12   ;;  %s849_s11 = sphi %s888_s11, %s1366_s11   ;;  %s845_s10 = sphi %s886_s10, %s1365_s10   ;;  %s841_s9 = sphi %s884_s9, %s1364_s9  }
   0x9   : > { %s30_s17 = sadd.s32 1, %s857_s13  ;;  %s42_s18 = sadd.s32 1, %s849_s11 }
   0xa   : > { %p31_p0 = scmp.ge.s32.totalorder %s30_s17, 2  ;;  %p49_p1 = scmp.ne.s32.totalorder %s849_s11, %s845_s10 }
   0xb   : > { %p50_p2 = scmp.eq.s32.totalorder %s861_s14, 0  ;;  %p55_p3 = scmp.ne.s32.totalorder %s845_s10, %s841_s9 }
   0xc   : > { %s1370_s17 = smov (%p31_p0, %s30_s17), 0  ;;  %p56_p5 = scmp.eq.s32.totalorder %s570_s15, 0 }
   0xd   : > { %p925_p4 = por %p50_p2, %p49_p1  ;;  %s37_s20 = ssub.s32 %s857_s13, %s1370_s17 }
   0xe   : > { %p109_p6 = scmp.eq.s32.totalorder %s570_s15, 1  ;;  %p40_p7 = scmp.eq.s32.totalorder %s37_s20, 0 }
   0xf   : > { %p931_p8 = por %p56_p5, %p55_p3  ;;  %p115_p10 = scmp.eq.s32.totalorder %s571_s16, 1 }
  0x10   : > { %p935_p9 = por %p109_p6, %p49_p1  ;;  %p622_p13 = scmp.lt.s32.totalorder %s861_s14, 2 }
  0x11   : > { %s1350_s21 = scalar_select %p931_p8, 1, 0 }
  0x12   : > { %s1351_s22 = scalar_select %p935_p9, 1, 0 }
  0x13   : > { %s940_s23 = scalar_select %p40_p7, %s849_s11, %s42_s18  }
  0x14   : > { %p942_p11 = por %p115_p10, %p55_p3  ;;  %s949_s25 = sand.u32 1, %s849_s11  }
  0x15   : > { %s602_s26 = smul.u32 38, %s949_s25  ;;  %p955_p0 = pnand %p622_p13, %p925_p4 }
  0x16   : > { %s1352_s24 = scalar_select %p942_p11, 1, 0 }
  0x17   : > { %s603_s27 = smul.u32 608, %s857_s13  ;;  %s139_s4 = scalar_lea.vmem [#allocation2], %s602_s26 }
  0x18   : > { %s147_s5 = sshll.u32 %s139_s4, 4  ;;  %s136_s6 = scalar_lea.sflag [#allocation3], %s949_s25  ;;  %s964_s5 = int_to_ptr.vmem [resolvable:$true] %s147_s5 }
  0x19   : > { %s962_s3 = scalar_lea.hbm %s1341_s0, %s603_s27  ;;  %p717_p3 = pneg %p955_p0 }
  0x1a   : > { %s715_s7 = scalar_lea.hbm %s962_s3, 608  ;;  %s720_s16 = scalar_lea.hbm %s1341_s0, 1216 }
  0x1b   : > { %p716_p2 = scmp.ne.s32.totalorder %s962_s3, %s715_s7  ;;  %p721_p6 = scmp.lt.u32.totalorder %s962_s3, %s1341_s0 }
  0x1c   : > { %p722_p7 = scmp.lt.u32.totalorder %s720_s16, %s715_s7  ;;  %p724_p13 = scmp.lt.u32.totalorder %s715_s7, %s962_s3 }
  0x1d   : > { %p718_p4 = pnand %p717_p3, %p716_p2 }
  0x1e   : > { %p723_p10 = por %p722_p7, %p721_p6 }
  0x1f   : > { %p719_p5 = pneg %p718_p4 }
  0x20   : > { %p725_p12 = por %p724_p13, %p723_p10 }
  0x22   : > { %p726_p1 = pnand %p725_p12, %p719_p5 }
  0x24   : > { %729 = shalt.err (!%p726_p1)
}
  0x25   : > { %s730_s20 = scalar_lea.vmem %s964_s5, 608  ;;  %s863_s26 = smov [#allocation2]  }
  0x26   : > { %p731_p2 = scmp.ne.s32.totalorder %s964_s5, %s730_s20  ;;  %s735_s27 = sshll.u32 %s863_s26, 4  ;;  %s736_s27 = int_to_ptr.vmem [resolvable:$false] %s735_s27 }
  0x27   : > { %s737_s29 = scalar_lea.vmem %s736_s27, 1216  ;;  %p738_p9 = scmp.lt.s32.totalorder %s964_s5, %s736_s27 }
  0x28   : > { %p733_p4 = pnand %p731_p2, %p717_p3  ;;  %p739_p6 = scmp.lt.s32.totalorder %s737_s29, %s730_s20 }
  0x2a   : > { %p734_p11 = pneg %p733_p4  ;;  %p740_p7 = por %p739_p6, %p738_p9 }
  0x2c   : > { %p741_p10 = pnand %p740_p7, %p734_p11 }
  0x2e   : > { %744 = shalt.err (!%p741_p10)
}
  0x2f   : > { %s864_s30 = smov 32   ;;  %s865_s4 = smov 2  }
  0x30   : > { %614 = dma.hbm_to_vmem [thread:$0]  (!%p955_p0), %s962_s3, 608, %s964_s5, %s136_s6, %s864_s30, %s864_s30, %s865_s4  }
  0x31   : > { %p174_p12 = scmp.lt.s32.totalorder %s861_s14, 3  ;;  %s575_s7 = sshll.u32 %s949_s25, 1 }
  0x32   : > { %s576_s8 = sshll.u32 %s857_s13, 5  ;;  %p1354_p9 = scmp.ge.s32.totalorder %s861_s14, 1 }
  0x33   : > { %s1007_s19 = scalar_lea.hbm %s1342_s1, %s576_s8  ;;  %s161_s20 = scalar_lea.vmem [#allocation5], %s575_s7 }
  0x34   : > { %p1000_p11 = pnand %p1354_p9, %p174_p12  ;;  %s169_s26 = sshll.u32 %s161_s20, 4  ;;  %s170_s26 = int_to_ptr.vmem [resolvable:$true] %s169_s26 }
  0x35   : > { %s158_s3 = scalar_lea.sflag [#allocation6], %s949_s25  ;;  %s745_s5 = scalar_lea.hbm %s1007_s19, 32 }
  0x36   : > { %s1355_s15 = scalar_select %p1000_p11, 1, 0 }
  0x37   : > { %p746_p1 = scmp.ne.s32.totalorder %s1007_s19, %s745_s5  ;;  %s750_s29 = scalar_lea.hbm %s1342_s1, 64 }
  0x38   : > { %p751_p2 = scmp.lt.u32.totalorder %s1007_s19, %s1342_s1  ;;  %p752_p4 = scmp.lt.u32.totalorder %s750_s29, %s745_s5 }
  0x39   : > { %p748_p5 = pnand %p746_p1, %p717_p3  ;;  %p754_p7 = scmp.lt.u32.totalorder %s745_s5, %s1007_s19 }
  0x3a   : > { %p753_p6 = por %p752_p4, %p751_p2 }
  0x3b   : > { %p749_p13 = pneg %p748_p5 }
  0x3c   : > { %p755_p10 = por %p754_p7, %p753_p6 }
  0x3e   : > { %p756_p12 = pnand %p755_p10, %p749_p13 }
  0x40   : > { %759 = shalt.err (!%p756_p12)
}
  0x41   : > { %s760_s25 = scalar_lea.vmem %s170_s26, 32  ;;  %s866_s7 = smov [#allocation5]  }
  0x42   : > { %p761_p9 = scmp.ne.s32.totalorder %s170_s26, %s760_s25  ;;  %s765_s8 = sshll.u32 %s866_s7, 4  ;;  %s766_s8 = int_to_ptr.vmem [resolvable:$false] %s765_s8 }
  0x43   : > { %s767_s16 = scalar_lea.vmem %s766_s8, 64  ;;  %p768_p8 = scmp.lt.s32.totalorder %s170_s26, %s766_s8 }
  0x44   : > { %p763_p1 = pnand %p761_p9, %p717_p3  ;;  %p769_p11 = scmp.lt.s32.totalorder %s767_s16, %s760_s25 }
  0x46   : > { %p764_p5 = pneg %p763_p1  ;;  %p770_p2 = por %p769_p11, %p768_p8 }
  0x48   : > { %p771_p4 = pnand %p770_p2, %p764_p5 }
  0x4a   : > { %774 = shalt.err (!%p771_p4)
}
  0x4b   : > { %617 = dma.hbm_to_vmem [thread:$0]  (!%p955_p0), %s1007_s19, 32, %s170_s26, %s158_s3  }
  0x4c   : > { %p1356_p13 = scmp.ne.s32.totalorder %s1355_s15, 0 }
  0x4d   : > { %s1032_s18 = sand.u32 (!%p1356_p13), 1, %s845_s10   ;;  %p1357_p8 = scmp.ne.s32.totalorder (!%p1356_p13), %s1350_s21, 0 }
  0x4e   : > { %178 = sbr.rel (%p1356_p13) target bundleno = 211 (0xd3), region = 28  ;;  %s181_s5 = scalar_lea.sflag (!%p1356_p13), [#allocation3], %s1032_s18 }
  0x4f   : > { %s604_s20 = smul.u32 (!%p1356_p13), 38, %s1032_s18 }
  0x51   : > { %s1036_s6 = scalar_lea.vmem (!%p1356_p13), [#allocation2], %s604_s20 }
  0x55   : > { %828 = dma.done.wait (%p1357_p8), %s181_s5, 608  }
  0x56   : > { %830 = vsyncadd (%p1357_p8), %s181_s5, 4294966688  ;;  %s578_s28 = sshll.u32 %s1032_s18, 1  ;;  %s190_s15 = scalar_lea.sflag [#allocation6], %s1032_s18 }
  0x57   : > { %s193_s19 = scalar_lea.vmem [#allocation5], %s578_s28 }
  0x58   : > { %832 = dma.done.wait (%p1357_p8), %s190_s15, 32  }
  0x59   : > { %834 = vsyncadd (%p1357_p8), %s190_s15, 4294967264  ;;  %v1051_v0 = vld [vmem:[%s1036_s6] sm:$0x3]  ;;  %v1054_v1 = vld [vmem:[%s1036_s6 + $0x2] sm:$0x3]  ;;  %s218_s21 = scalar_lea.vmem [#allocation7], %s578_s28 }
  0x5a   : > { %v1057_v2 = vld [vmem:[%s1036_s6 + $0x4] sm:$0x3]  ;;  %v275_v3 = vmax.f32 %v1051_v0, %v1054_v1  ;;  %v1062_v4 = vld [vmem:[%s1036_s6 + $0x6] sm:$0x3]  ;;  %v1064_v5 = vld [vmem:[%s193_s19] sm:$0x3] }
  0x5b   : > { %v1068_v7 = vld [vmem:[%s1036_s6 + $0x8] sm:$0x3]  ;;  %v1072_v9 = vld [vmem:[%s1036_s6 + $0xa] sm:$0x3]  ;;  %vm297_vm0 = vcmp.eq.s32.totalorder %v1064_v5, 0  ;;  %vm304_vm1 = vcmp.eq.s32.totalorder %v1064_v5, 1 }
  0x5c   : > { %v276_v6 = vmax.f32 %v275_v3, %v1057_v2  ;;  %v298_v11 = vsel %vm297_vm0, %v1051_v0, 0.0  ;;  %vm311_vm2 = vcmp.eq.s32.totalorder %v1064_v5, 2  ;;  %v1082_v12 = vld [vmem:[%s1036_s6 + $0xc] sm:$0x3]  ;;  %vm318_vm3 = vcmp.eq.s32.totalorder %v1064_v5, 3  ;;  %s447_s26 = sshll.u32 %s218_s21, 4  ;;  %s1289_s26 = int_to_ptr.vmem [resolvable:$true] %s447_s26 }
  0x5d   : > { %v305_v13 = vsel %vm304_vm1, %v1054_v1, %v298_v11  ;;  %vm325_vm4 = vcmp.eq.s32.totalorder %v1064_v5, 4  ;;  %vm332_vm5 = vcmp.eq.s32.totalorder %v1064_v5, 5  ;;  %v1095_v16 = vld [vmem:[%s1036_s6 + $0xe] sm:$0x3]  ;;  %vm339_vm6 = vcmp.eq.s32.totalorder %v1064_v5, 6  ;;  %s599_s3 = sshll.u32 %s853_s12, 5 }
  0x5e   : > { %v277_v8 = vmax.f32 %v276_v6, %v1062_v4  ;;  %v312_v15 = vsel %vm311_vm2, %v1057_v2, %v305_v13  ;;  %vm346_vm7 = vcmp.eq.s32.totalorder %v1064_v5, 7  ;;  %v1107_v20 = vld [vmem:[%s1036_s6 + $0x10] sm:$0x3]  ;;  %vm353_vm8 = vcmp.eq.s32.totalorder %v1064_v5, 8  ;;  %v1119_v24 = vld [vmem:[%s1036_s6 + $0x12] sm:$0x3]  ;;  %s1294_s30 = scalar_lea.hbm %s1343_s2, %s599_s3 }
  0x5f   : > { %v319_v17 = vsel %vm318_vm3, %v1062_v4, %v312_v15  ;;  %vm360_vm9 = vcmp.eq.s32.totalorder %v1064_v5, 9  ;;  %vm367_vm10 = vcmp.eq.s32.totalorder %v1064_v5, 10  ;;  %vm1346_vm11 = vcmp.eq.s32.totalorder %v1064_v5, 11  ;;  %v1131_v28 = vld [vmem:[%s1036_s6 + $0x14] sm:$0x3]  ;;  %s433_s4 = scalar_lea.sflag [#allocation4], %s1032_s18 }
  0x60   : > { %v278_v10 = vmax.f32 %v277_v8, %v1068_v7  ;;  %v326_v19 = vsel %vm325_vm4, %v1068_v7, %v319_v17  ;;  %vm1347_vm12 = vcmp.eq.s32.totalorder %v1064_v5, 12  ;;  %v1138_v30 = vld [vmem:[%s1036_s6 + $0x16] sm:$0x3]  ;;  %vm1348_vm13 = vcmp.eq.s32.totalorder %v1064_v5, 13  ;;  %v1146_v33 = vld [vmem:[%s1036_s6 + $0x18] sm:$0x3] }
  0x61   : > { %v333_v21 = vsel %vm332_vm5, %v1072_v9, %v326_v19  ;;  %vm395_vm14 = vcmp.eq.s32.totalorder %v1064_v5, 14  ;;  %v1153_v35 = vld [vmem:[%s1036_s6 + $0x1a] sm:$0x3]  ;;  %vm402_vm15 = vcmp.eq.s32.totalorder %v1064_v5, 15  ;;  %v1161_v38 = vld [vmem:[%s1036_s6 + $0x1c] sm:$0x3] }
  0x62   : > { %v279_v14 = vmax.f32 %v278_v10, %v1072_v9  ;;  %v340_v23 = vsel %vm339_vm6, %v1082_v12, %v333_v21  ;;  %v1168_v40 = vld [vmem:[%s1036_s6 + $0x1e] sm:$0x3]  ;;  %v1176_v43 = vld [vmem:[%s1036_s6 + $0x20] sm:$0x3]  ;;  %v1183_v45 = vld [vmem:[%s1036_s6 + $0x22] sm:$0x3] }
  0x63   : > { %v347_v25 = vsel %vm346_vm7, %v1095_v16, %v340_v23  ;;  %v1190_v48 = vld [vmem:[%s1036_s6 + $0x24] sm:$0x3]  ;;  %v867_v13 = vmov 0.0   ;;  %s775_s25 = scalar_lea.vmem %s1289_s26, 32  ;;  %p1361_p3 = scmp.ne.s32.totalorder %s1351_s22, 0 }
  0x64   : > { %v280_v18 = vmax.f32 %v279_v14, %v1082_v12  ;;  %v354_v27 = vsel %vm353_vm8, %v1107_v20, %v347_v25  ;;  %p776_p0 = scmp.ne.s32.totalorder %s1289_s26, %s775_s25  ;;  %s868_s12 = smov [#allocation7]  }
  0x65   : > { %v361_v29 = vsel %vm360_vm9, %v1119_v24, %v354_v27  ;;  %s779_s7 = sshll.u32 %s868_s12, 4  ;;  %s780_s7 = int_to_ptr.vmem [resolvable:$false] %s779_s7 }
  0x66   : > { %v281_v22 = vmax.f32 %v280_v18, %v1095_v16  ;;  %v368_v32 = vsel %vm367_vm10, %v1131_v28, %v361_v29  ;;  %p777_p11 = pnand %p776_p0, %p1361_p3  ;;  %s781_s8 = scalar_lea.vmem %s780_s7, 64 }
  0x67   : > { %v375_v34 = vsel %vm1346_vm11, %v1138_v30, %v368_v32  ;;  %vm409_vm11 = vcmp.eq.s32.totalorder %v1064_v5, 16  ;;  %p782_p7 = scmp.lt.s32.totalorder %s1289_s26, %s780_s7  ;;  %p783_p10 = scmp.lt.s32.totalorder %s781_s8, %s775_s25 }
  0x68   : > { %v282_v26 = vmax.f32 %v281_v22, %v1107_v20  ;;  %v382_v37 = vsel %vm1347_vm12, %v1146_v33, %v375_v34  ;;  %vm416_vm12 = vcmp.eq.s32.totalorder %v1064_v5, 17  ;;  %p778_p6 = pneg %p777_p11 }
  0x69   : > { %v389_v39 = vsel %vm1348_vm13, %v1153_v35, %v382_v37  ;;  %vm423_vm13 = vcmp.eq.s32.totalorder %v1064_v5, 18  ;;  %p784_p12 = por %p783_p10, %p782_p7 }
  0x6a   : > { %v283_v31 = vmax.f32 %v282_v26, %v1119_v24  ;;  %v396_v42 = vsel %vm395_vm14, %v1161_v38, %v389_v39 }
  0x6b   : > { %v403_v44 = vsel %vm402_vm15, %v1168_v40, %v396_v42  ;;  %p785_p9 = pnand %p784_p12, %p778_p6 }
  0x6c   : > { %v284_v36 = vmax.f32 %v283_v31, %v1131_v28  ;;  %v410_v47 = vsel %vm409_vm11, %v1176_v43, %v403_v44 }
  0x6d   : > { %v417_v49 = vsel %vm416_vm12, %v1183_v45, %v410_v47 }
  0x6e   : > { %v285_v41 = vmax.f32 %v284_v36, %v1138_v30  ;;  %v1199_v51 = vsel %vm423_vm13, %v1190_v48, %v417_v49 }
  0x70   : > { %v286_v46 = vmax.f32 %v285_v41, %v1146_v33 }
  0x72   : > { %v287_v50 = vmax.f32 %v286_v46, %v1153_v35 }
  0x74   : > { %v288_v52 = vmax.f32 %v287_v50, %v1161_v38 }
  0x76   : > { %v289_v53 = vmax.f32 %v288_v52, %v1168_v40 }
  0x78   : > { %v290_v54 = vmax.f32 %v289_v53, %v1176_v43 }
  0x7a   : > { %v291_v55 = vmax.f32 %v290_v54, %v1183_v45 }
  0x7c   : > { %v1206_v56 = vmax.f32 %v291_v55, %v1190_v48 }
  0x7e   : > { %v293_v57 = vsub.f32 %v1051_v0, %v1206_v56  ;;  %v300_v58 = vsub.f32 %v1054_v1, %v1206_v56  ;;  %v307_v59 = vsub.f32 %v1057_v2, %v1206_v56  ;;  %v314_v60 = vsub.f32 %v1062_v4, %v1206_v56 }
  0x7f   : > { %v321_v61 = vsub.f32 %v1068_v7, %v1206_v56  ;;  %v328_v8 = vsub.f32 %v1072_v9, %v1206_v56  ;;  %v335_v1 = vsub.f32 %v1082_v12, %v1206_v56  ;;  %v342_v4 = vsub.f32 %v1095_v16, %v1206_v56 }
  0x80   : > { %v294_v62 = vmul.f32 1.442695, %v293_v57  ;;  %v301_v63 = vmul.f32 1.442695, %v300_v58  ;;  %v308_v3 = vmul.f32 1.442695, %v307_v59  ;;  %v349_v10 = vsub.f32 %v1107_v20, %v1206_v56 }
  0x81   : > { %v315_v6 = vmul.f32 1.442695, %v314_v60  ;;  %v322_v0 = vmul.f32 1.442695, %v321_v61  ;;  %v329_v2 = vmul.f32 1.442695, %v328_v8  ;;  %v356_v9 = vsub.f32 %v1119_v24, %v1206_v56 }
  0x82   : > { %675 = vpow2.f32 %v294_v62  ;;  %v336_v7 = vmul.f32 1.442695, %v335_v1  ;;  %v343_v11 = vmul.f32 1.442695, %v342_v4  ;;  %v299_v12 = vsel %vm297_vm0, 0.05570516, %v867_v13 }
  0x83   : > { %677 = vpow2.f32 %v301_v63  ;;  %v350_v14 = vmul.f32 1.442695, %v349_v10  ;;  %v363_v15 = vsub.f32 %v1131_v28, %v1206_v56  ;;  %v306_v18 = vsel %vm304_vm1, 0.32337478, %v299_v12 }
  0x84   : > { %679 = vpow2.f32 %v308_v3  ;;  %v357_v19 = vmul.f32 1.442695, %v356_v9  ;;  %v370_v20 = vsub.f32 %v1138_v30, %v1206_v56  ;;  %v377_v25 = vsub.f32 %v1146_v33, %v1206_v56 }
  0x85   : > { %681 = vpow2.f32 %v315_v6  ;;  %v364_v24 = vmul.f32 1.442695, %v363_v15  ;;  %v313_v27 = vsel %vm311_vm2, 0.08998544, %v306_v18  ;;  %v384_v31 = vsub.f32 %v1153_v35, %v1206_v56 }
  0x86   : > { %683 = vpow2.f32 %v322_v0  ;;  %v371_v29 = vmul.f32 1.442695, %v370_v20  ;;  %v320_v34 = vsel %vm318_vm3, 1.0360271, %v313_v27  ;;  %v378_v36 = vmul.f32 1.442695, %v377_v25 }
  0x87   : > { %685 = vpow2.f32 %v329_v2  ;;  %v391_v33 = vsub.f32 %v1161_v38, %v1206_v56  ;;  %v385_v41 = vmul.f32 1.442695, %v384_v31  ;;  %v398_v42 = vsub.f32 %v1168_v40, %v1206_v56 }
  0x88   : > { %687 = vpow2.f32 %v336_v7  ;;  %v327_v35 = vsel %vm325_vm4, 1.0341315, %v320_v34  ;;  %v405_v49 = vsub.f32 %v1176_v43, %v1206_v56  ;;  %v412_v40 = vsub.f32 %v1183_v45, %v1206_v56 }
  0x89   : > { %689 = vpow2.f32 %v343_v11  ;;  %v392_v47 = vmul.f32 1.442695, %v391_v33  ;;  %v334_v38 = vsel %vm332_vm5, 1.6819544, %v327_v35  ;;  %v399_v53 = vmul.f32 1.442695, %v398_v42 }
  0x8a   : > { %691 = vpow2.f32 %v350_v14  ;;  %v406_v57 = vmul.f32 1.442695, %v405_v49  ;;  %v419_v58 = vsub.f32 %v1190_v48, %v1206_v56  ;;  %v341_v43 = vsel %vm339_vm6, 5.5854053, %v334_v38 }
  0x8b   : > { %693 = vpow2.f32 %v357_v19  ;;  %v413_v61 = vmul.f32 1.442695, %v412_v40  ;;  %v348_v3 = vsel %vm346_vm7, 3.56564, %v341_v43  ;;  %vm1358_vm0 = vcmp.eq.s32.totalorder %v1064_v5, 11 }
  0x8c   : > { %v676_v16 = vpop.eup %675  ;;  %695 = vpow2.f32 %v364_v24  ;;  %v420_v45 = vmul.f32 1.442695, %v419_v58  ;;  %v355_v48 = vsel %vm353_vm8, 0.12704977, %v348_v3  ;;  %vm1359_vm1 = vcmp.eq.s32.totalorder %v1064_v5, 12 }
  0x8d   : > { %v678_v17 = vpop.eup %677  ;;  %697 = vpow2.f32 %v371_v29  ;;  %v362_v7 = vsel %vm360_vm9, 1.0, %v355_v48  ;;  %vm1360_vm2 = vcmp.eq.s32.totalorder %v1064_v5, 13 }
  0x8e   : > { %v680_v21 = vpop.eup %679  ;;  %v303_v22 = vadd.f32 %v678_v17, %v676_v16  ;;  %699 = vpow2.f32 %v378_v36  ;;  %v369_v9 = vsel %vm367_vm10, 0.46783718, %v362_v7 }
  0x8f   : > { %v682_v23 = vpop.eup %681  ;;  %701 = vpow2.f32 %v385_v41  ;;  %v376_v16 = vsel %vm1358_vm0, 1.3455153, %v369_v9 }
  0x90   : > { %v310_v26 = vadd.f32 %v680_v21, %v303_v22  ;;  %v684_v28 = vpop.eup %683  ;;  %703 = vpow2.f32 %v392_v47  ;;  %v383_v19 = vsel %vm1359_vm1, 5.2997413, %v376_v16 }
  0x91   : > { %v686_v30 = vpop.eup %685  ;;  %705 = vpow2.f32 %v399_v53  ;;  %v390_v22 = vsel %vm1360_vm2, 0.2834253, %v383_v19 }
  0x92   : > { %v317_v32 = vadd.f32 %v682_v23, %v310_v26  ;;  %v688_v39 = vpop.eup %687  ;;  %707 = vpow2.f32 %v406_v57  ;;  %v397_v23 = vsel %vm395_vm14, 0.9396095, %v390_v22 }
  0x93   : > { %v690_v46 = vpop.eup %689  ;;  %709 = vpow2.f32 %v413_v61  ;;  %v404_v24 = vsel %vm402_vm15, 0.8155181, %v397_v23 }
  0x94   : > { %v324_v37 = vadd.f32 %v684_v28, %v317_v32  ;;  %v692_v52 = vpop.eup %691  ;;  %711 = vpow2.f32 %v420_v45  ;;  %v411_v25 = vsel %vm409_vm11, 0.42679146, %v404_v24 }
  0x95   : > { %v694_v55 = vpop.eup %693  ;;  %v418_v27 = vsel %vm416_vm12, 3.6399074, %v411_v25 }
  0x96   : > { %v331_v44 = vadd.f32 %v686_v30, %v324_v37  ;;  %v696_v60 = vpop.eup %695  ;;  %v425_v31 = vsel %vm423_vm13, 2.783762, %v418_v27 }
  0x97   : > { %v698_v63 = vpop.eup %697 }
  0x98   : > { %v338_v50 = vadd.f32 %v688_v39, %v331_v44  ;;  %v700_v8 = vpop.eup %699 }
  0x99   : > { %v702_v1 = vpop.eup %701 }
  0x9a   : > { %v345_v54 = vadd.f32 %v690_v46, %v338_v50  ;;  %v704_v4 = vpop.eup %703 }
  0x9b   : > { %v706_v11 = vpop.eup %705 }
  0x9c   : > { %v352_v59 = vadd.f32 %v692_v52, %v345_v54  ;;  %v708_v12 = vpop.eup %707 }
  0x9d   : > { %v710_v15 = vpop.eup %709 }
  0x9e   : > { %v359_v62 = vadd.f32 %v694_v55, %v352_v59  ;;  %v712_v18 = vpop.eup %711 }
  0xa0   : > { %v366_v6 = vadd.f32 %v696_v60, %v359_v62 }
  0xa2   : > { %v373_v0 = vadd.f32 %v698_v63, %v366_v6 }
  0xa4   : > { %v380_v2 = vadd.f32 %v700_v8, %v373_v0 }
  0xa6   : > { %v387_v10 = vadd.f32 %v702_v1, %v380_v2 }
  0xa8   : > { %v394_v13 = vadd.f32 %v704_v4, %v387_v10 }
  0xaa   : > { %v401_v14 = vadd.f32 %v706_v11, %v394_v13 }
  0xac   : > { %v408_v17 = vadd.f32 %v708_v12, %v401_v14 }
  0xae   : > { %v415_v20 = vadd.f32 %v710_v15, %v408_v17 }
  0xb0   : > { %v422_v21 = vadd.f32 %v712_v18, %v415_v20 }
  0xb2   : > { %713 = vlog2.f32 %v422_v21 }
  0xbc   : > { %v714_v26 = vpop.eup %713 }
  0xbd   : > { %v427_v28 = vmul.f32 0.6931472, %v714_v26 }
  0xbf   : > { %v428_v29 = vadd.f32 %v427_v28, %v1206_v56 }
  0xc1   : > { %v429_v32 = vsub.f32 %v428_v29, %v1199_v51 }
  0xc3   : > { %v430_v30 = vmul.f32 %v429_v32, %v425_v31 }
  0xc5   : > { %431 = vst [vmem:[%s218_s21] sm:$0x3] %v430_v30 }
  0xc6   : > { %788 = shalt.err (!%p785_p9)
}
  0xc7   : > { %s789_s16 = scalar_lea.hbm %s1294_s30, 32  ;;  %s793_s5 = scalar_lea.hbm %s1343_s2, 64 }
  0xc8   : > { %p790_p1 = scmp.ne.s32.totalorder %s1294_s30, %s789_s16  ;;  %p794_p4 = scmp.lt.u32.totalorder %s1294_s30, %s1343_s2 }
  0xc9   : > { %p795_p13 = scmp.lt.u32.totalorder %s793_s5, %s789_s16  ;;  %p797_p0 = scmp.lt.u32.totalorder %s789_s16, %s1294_s30 }
  0xca   : > { %p791_p5 = pnand %p790_p1, %p1361_p3 }
  0xcb   : > { %p796_p8 = por %p795_p13, %p794_p4 }
  0xcc   : > { %p792_p2 = pneg %p791_p5 }
  0xcd   : > { %p798_p11 = por %p797_p0, %p796_p8 }
  0xcf   : > { %p799_p6 = pnand %p798_p11, %p792_p2 }
  0xd1   : > { %802 = shalt.err (!%p799_p6)
}
  0xd2   : > { %609 = dma.vmem_to_hbm [thread:$0]  (%p1361_p3), %s1289_s26, 32, %s1294_s30, %s433_s4  }
  0xd3 PF: > { %s459_s15 = sand.u32 1, %s841_s9   ;;  %p1362_p7 = scmp.ne.s32.totalorder %s1352_s24, 0 }
  0xd4   : > { %p1363_p10 = scmp.ge.s32.totalorder %s861_s14, 2  ;;  %s460_s19 = scalar_lea.sflag [#allocation4], %s459_s15 }
  0xd6   : > { %p619_p12 = pnand %p1363_p10, %p1362_p7 }
  0xd8   : > { %836 = dma.done.wait (!%p619_p12), %s460_s19, 32  }
  0xd9   : > { %838 = vsyncadd (!%p619_p12), %s460_s19, 4294967264  ;;  %s21_s14 = sadd.s32 1, %s861_s14   ;;  %s1364_s9 = smov %s845_s10 }
  0xda   : > { %p18_p9 = scmp.ge.s32.totalorder %s21_s14, 4   ;;  %s1365_s10 = smov %s849_s11 }
  0xdb   : > { %s1366_s11 = smov %s940_s23  ;;  %s1367_s12 = smov %s857_s13 }
  0xdc   : > { %s1368_s13 = smov %s1370_s17  ;;  %20 = sbr.rel (!%p18_p9) target bundleno = 8 (0x8), region = 104 }
  0xe3   :  { %465 = vsyncpa [#allocation3], 1 }
  0xe4   :  { %467 = vsyncpa [#allocation3 + $0x1], 1 }
  0xe5   :  { %468 = vsyncpa [#allocation6], 1 }
  0xe6   :  { %470 = vsyncpa [#allocation6 + $0x1], 1 }
  0xe7   :  { %471 = vsyncpa [#allocation4], 1 }
  0xe8   :  { %473 = vsyncpa [#allocation4 + $0x1], 1 }

</bundles_post_ra>
